<compile_context>
chip_gen: v7x
topology: tpu7x:2x2x1
jax: 0.10.0
libtpu: 0.0.40
codegen_flags: <defaults>
</compile_context>

<pallas_src>
import functools

import jax
import jax.numpy as jnp
from jax import lax
from jax.experimental import pallas as pl
from jax.experimental.pallas import tpu as pltpu


def _ext_attn_kernel(x_ref, w0_ref, w1_ref, o_ref,
                     xc_ref, ec_ref, mt_ref, m_ref, l_ref, *,
                     tn, nt, n_valid):
    """Grid = (B, 2, nt).

    phase 0: a = W0 @ x (bf16 MXU, f32 acc); cache x tile (residual) and
             bf16 exp(a - m_tile); maintain running row max / rescaled exp-sum.
    phase 1: p = e * exp(m_tile - m_final) / l_final  (softmax over N),
             l1-normalize over K, out = W1 @ p + x_cached, relu, store.
    """
    ph = pl.program_id(1)
    t = pl.program_id(2)

    # --- cache-slice helpers (static branch on nt) ---------------------------
    if nt == 1:
        def cload(ref):
            return ref[...]

        def cstore(ref, val):
            ref[...] = val

        def mt_store(val):
            mt_ref[...] = val

        def mt_load():
            return mt_ref[...]
    else:
        start = pl.multiple_of(t * tn, 128)   # tn is a multiple of 128 here

        def cload(ref):
            return ref[:, pl.ds(start, tn)]

        def cstore(ref, val):
            ref[:, pl.ds(start, tn)] = val

        # Per-tile max lives in column t of a (K, nt) scratch.  Use a
        # full-width select-store / masked-reduce (static shapes only) instead
        # of a width-1 dynamic lane slice.
        def mt_store(val):
            lane = lax.broadcasted_iota(jnp.int32, (1, nt), 1)
            mt_ref[...] = jnp.where(lane == t, val, mt_ref[...])

        def mt_load():
            lane = lax.broadcasted_iota(jnp.int32, (1, nt), 1)
            return jnp.sum(jnp.where(lane == t, mt_ref[...], 0.0),
                           axis=-1, keepdims=True)

    # --- init online-softmax state once per batch -----------------------------
    @pl.when(jnp.logical_and(ph == 0, t == 0))
    def _init():
        m_ref[...] = jnp.full(m_ref.shape, -1e30, dtype=m_ref.dtype)
        l_ref[...] = jnp.zeros(l_ref.shape, dtype=l_ref.dtype)

    # --- phase 0: stats + caches ----------------------------------------------
    @pl.when(ph == 0)
    def _stats():
        x_t = x_ref[...]                                        # (C, tn)
        a = jnp.dot(w0_ref[...], x_t.astype(jnp.bfloat16),
                    preferred_element_type=jnp.float32)         # (K, tn) f32
        if nt * tn != n_valid:
            # Only emitted when the last tile is ragged (static check): mask
            # out-of-range columns so they cannot pollute max / sum.
            col = lax.broadcasted_iota(jnp.int32, (1, tn), 1) + t * tn
            a = jnp.where(col < n_valid, a, -1e30)
        m_t = jnp.max(a, axis=-1, keepdims=True)                # (K, 1)
        e = jnp.exp(a - m_t)                                    # single big exp pass
        cstore(xc_ref, x_t)                                     # residual cache
        cstore(ec_ref, e.astype(jnp.bfloat16))                  # numerator cache
        mt_store(m_t)                                           # per-tile max
        m_prev = m_ref[...]
        m_new = jnp.maximum(m_prev, m_t)
        l_ref[...] = (l_ref[...] * jnp.exp(m_prev - m_new)
                      + jnp.sum(e, axis=-1, keepdims=True) * jnp.exp(m_t - m_new))
        m_ref[...] = m_new

    # --- phase 1: normalize, project, residual, relu --------------------------
    @pl.when(ph == 1)
    def _finalize():
        e = cload(ec_ref).astype(jnp.float32)                   # (K, tn)
        corr = jnp.exp(mt_load() - m_ref[...])                  # (K, 1)
        inv_l = pl.reciprocal(l_ref[...], approx=True)          # (K, 1), EUP
        p = e * (corr * inv_l)                                  # softmax over N
        col_sum = jnp.sum(p, axis=0, keepdims=True)             # (1, tn)
        p = p / (1e-9 + col_sum)                                # l1 over K (exact)
        out = jnp.dot(w1_ref[...], p.astype(jnp.bfloat16),
                      preferred_element_type=jnp.float32)       # (C, tn) f32
        res = cload(xc_ref).astype(jnp.float32)                 # residual
        o_ref[...] = jnp.maximum(out + res, 0.0).astype(o_ref.dtype)


def external_attention(x, w0, w1):
    """x: (B, C, N); w0: (K, C); w1: (C, K).  Returns (B, C, N) in x.dtype."""
    B, C, N = x.shape
    K = w0.shape[0]
    out_dtype = x.dtype

    # Weights are tiny -> bf16 for the MXU.  x is fed at its native dtype (no
    # wrapper-side cast/pad/slice copies); the kernel casts per tile.
    w0 = w0.astype(jnp.bfloat16)
    w1 = w1.astype(jnp.bfloat16)

    # N tiling: big lane-dense tiles; full-dim single tile when N is small.
    TN_MAX = 2048
    if N <= TN_MAX:
        tn, nt = N, 1                 # block == full dim (legal for any N)
    else:
        tn = TN_MAX                   # multiple of 128 -> aligned cache slices
        nt = -(-N // tn)              # cdiv; ragged last tile masked in-kernel
    ntot = nt * tn

    kernel = functools.partial(_ext_attn_kernel, tn=tn, nt=nt, n_valid=N)

    # VMEM budget: ~75% of this chip's capacity (≈48 MiB on v7x, ≈96 MiB on
    # v5e/v6e) so the bf16 exp cache / x cache and wide tiles fit with headroom.
    try:
        vmem_cap = int(pltpu.get_tpu_info().vmem_capacity_bytes)
    except Exception:
        vmem_cap = 64 << 20
    vmem_limit = int(max(32 << 20, (vmem_cap * 3) // 4))

    # TODO(synk): for very large N (K*N*2 bytes approaching VMEM), switch the
    # exp cache to recompute-from-cached-x (O(1) scratch, one extra exp pass).

    x_idx = lambda b, ph, t: (b, 0, (1 - ph) * t + ph * (nt - 1))
    out_idx = lambda b, ph, t: (b, 0, ph * t)

    out = pl.pallas_call(
        kernel,
        out_shape=jax.ShapeDtypeStruct((B, C, N), out_dtype),
        grid_spec=pltpu.PrefetchScalarGridSpec(
            num_scalar_prefetch=0,
            grid=(B, 2, nt),   # batch x {stats, finalize} x N-tile
            in_specs=[
                pl.BlockSpec((pl.Squeezed(), C, tn), x_idx),
                pl.BlockSpec((K, C), lambda b, ph, t: (0, 0)),
                pl.BlockSpec((C, K), lambda b, ph, t: (0, 0)),
            ],
            out_specs=pl.BlockSpec((pl.Squeezed(), C, tn), out_idx),
            scratch_shapes=[
                pltpu.VMEM((C, ntot), x.dtype),        # cached x (residual)
                pltpu.VMEM((K, ntot), jnp.bfloat16),   # cached exp(a - m_tile)
                pltpu.VMEM((K, nt), jnp.float32),      # per-tile row max
                pltpu.VMEM((K, 1), jnp.float32),       # running row max
                pltpu.VMEM((K, 1), jnp.float32),       # running rescaled exp-sum
            ],
        ),
        compiler_params=pltpu.CompilerParams(
            # Batch axis parallel (megacore); phase / N-tile axes carry scratch
            # state and revisit output blocks, so they stay "arbitrary".
            dimension_semantics=("parallel", "arbitrary", "arbitrary"),
            vmem_limit_bytes=vmem_limit,
        ),
    )(x, w0, w1)

    return out


def _reference(x, w0, w1):
    # pure-JAX f32 reference for sanity checking
    attn = jnp.einsum("kc,bcn->bkn", w0, x)
    attn = jax.nn.softmax(attn, axis=-1)
    attn = attn / (1e-9 + jnp.sum(attn, axis=1, keepdims=True))
    out = jnp.einsum("ck,bkn->bcn", w1, attn)
    return jax.nn.relu(out + x)


if __name__ == "__main__":
    B, C, N, K = 2, 4, 16, 32   # K = 32 is fixed by the module spec.

    key = jax.random.PRNGKey(0)
    kx, k0, k1 = jax.random.split(key, 3)

    # bf16 activations / weights (Conv1d weights with the kernel dim squeezed).
    x = jax.random.normal(kx, (B, C, N), dtype=jnp.float32).astype(jnp.bfloat16)
    w0 = (jax.random.normal(k0, (K, C), dtype=jnp.float32) * 0.1).astype(jnp.bfloat16)
    w1 = (jax.random.normal(k1, (C, K), dtype=jnp.float32) * 0.1).astype(jnp.bfloat16)

    y = external_attention(x, w0, w1)
    y = jax.block_until_ready(y)

    y_ref = _reference(x.astype(jnp.float32), w0.astype(jnp.float32),
                       w1.astype(jnp.float32))
    assert jnp.allclose(y.astype(jnp.float32), y_ref, atol=3e-2, rtol=3e-2), \
        "mismatch vs reference"

    print("KERNEL_OK")
</pallas_src>

<mosaic_0001>
module attributes {stable_mosaic.version = 11 : i64} {
  func.func @_ext_attn_kernel(%arg0: i32, %arg1: i32, %arg2: i32, %arg3: memref<1x4x16xbf16, #tpu.memory_space<vmem>>, %arg4: memref<32x4xbf16, #tpu.memory_space<vmem>>, %arg5: memref<4x32xbf16, #tpu.memory_space<vmem>>, %arg6: memref<1x4x16xbf16, #tpu.memory_space<vmem>>, %arg7: memref<4x16xbf16, #tpu.memory_space<vmem>>, %arg8: memref<32x16xbf16, #tpu.memory_space<vmem>>, %arg9: memref<32x1xf32, #tpu.memory_space<vmem>>, %arg10: memref<32x1xf32, #tpu.memory_space<vmem>>, %arg11: memref<32x1xf32, #tpu.memory_space<vmem>>) attributes {dimension_semantics = [#tpu.dimension_semantics<parallel>, #tpu.dimension_semantics<arbitrary>, #tpu.dimension_semantics<arbitrary>], iteration_bounds = array<i64: 2, 2, 1>, scalar_prefetch = 0 : i64, scratch_operands = 5 : i64, tpu.core_type = #tpu.core_type<tc>, window_params = [{transform_indices = @transform_0, window_bounds = array<i64: 1, 4, 16>}, {pipeline_mode = #tpu.pipeline_mode<synchronous>, transform_indices = @transform_1, window_bounds = array<i64: 32, 4>}, {pipeline_mode = #tpu.pipeline_mode<synchronous>, transform_indices = @transform_2, window_bounds = array<i64: 4, 32>}, {transform_indices = @transform_3, window_bounds = array<i64: 1, 4, 16>}]} {
    %c0_i32 = arith.constant 0 : i32
    %0 = arith.cmpi eq, %arg1, %c0_i32 : i32
    %c0_i32_0 = arith.constant 0 : i32
    %1 = arith.cmpi eq, %arg2, %c0_i32_0 : i32
    %2 = arith.andi %0, %1 : i1
    %3 = arith.extui %2 : i1 to i32
    %c0_i32_1 = arith.constant 0 : i32
    %4 = arith.cmpi ne, %3, %c0_i32_1 : i32
    scf.if %4 {
      %cst = arith.constant -1.000000e+30 : f32
      %11 = vector.broadcast %cst : f32 to vector<32x1xf32>
      %c0 = arith.constant 0 : index
      %c0_5 = arith.constant 0 : index
      %12 = vector.load %arg10[%c0, %c0_5] : memref<32x1xf32, #tpu.memory_space<vmem>>, vector<32x1xf32>
      tpu.vector_store %arg10[%c0, %c0_5], %11 {strides = array<i32>} : memref<32x1xf32, #tpu.memory_space<vmem>>, vector<32x1xf32>,
      %cst_6 = arith.constant 0.000000e+00 : f32
      %13 = vector.broadcast %cst_6 : f32 to vector<32x1xf32>
      %c0_7 = arith.constant 0 : index
      %c0_8 = arith.constant 0 : index
      %14 = vector.load %arg11[%c0_7, %c0_8] : memref<32x1xf32, #tpu.memory_space<vmem>>, vector<32x1xf32>
      tpu.vector_store %arg11[%c0_7, %c0_8], %13 {strides = array<i32>} : memref<32x1xf32, #tpu.memory_space<vmem>>, vector<32x1xf32>,
    } else {
    }
    %c0_i32_2 = arith.constant 0 : i32
    %5 = arith.cmpi eq, %arg1, %c0_i32_2 : i32
    %6 = arith.extui %5 : i1 to i32
    %c0_i32_3 = arith.constant 0 : i32
    %7 = arith.cmpi ne, %6, %c0_i32_3 : i32
    scf.if %7 {
      %c0 = arith.constant 0 : index
      %c0_5 = arith.constant 0 : index
      %c0_6 = arith.constant 0 : index
      %11 = vector.load %arg3[%c0, %c0_5, %c0_6] : memref<1x4x16xbf16, #tpu.memory_space<vmem>>, vector<1x4x16xbf16>
      %12 = vector.shape_cast %11 : vector<1x4x16xbf16> to vector<4x16xbf16>
      %c0_7 = arith.constant 0 : index
      %c0_8 = arith.constant 0 : index
      %13 = vector.load %arg4[%c0_7, %c0_8] : memref<32x4xbf16, #tpu.memory_space<vmem>>, vector<32x4xbf16>
      %cst = arith.constant dense<0.000000e+00> : vector<32x16xf32>
      %14 = tpu.matmul %13, %12, %cst {dimension_numbers = #tpu.dot_dimension_numbers<[1], [0], [0], [1], [0, 0, 1, 1], [], []>} : vector<32x4xbf16>, vector<4x16xbf16>, vector<32x16xf32> -> vector<32x16xf32>
      %cst_9 = arith.constant dense<0xFF800000> : vector<32xf32>
      %15 = vector.multi_reduction <maximumf>, %14, %cst_9 [1] : vector<32x16xf32> to vector<32xf32>
      %16 = vector.shape_cast %15 : vector<32xf32> to vector<32x1xf32>
      %17 = vector.broadcast %16 : vector<32x1xf32> to vector<32x16xf32>
      %18 = arith.subf %14, %17 : vector<32x16xf32>
      %19 = math.exp %18 : vector<32x16xf32>
      %c0_10 = arith.constant 0 : index
      %c0_11 = arith.constant 0 : index
      %20 = vector.load %arg7[%c0_10, %c0_11] : memref<4x16xbf16, #tpu.memory_space<vmem>>, vector<4x16xbf16>
      tpu.vector_store %arg7[%c0_10, %c0_11], %12 {strides = array<i32>} : memref<4x16xbf16, #tpu.memory_space<vmem>>, vector<4x16xbf16>,
      %21 = arith.truncf %19 : vector<32x16xf32> to vector<32x16xbf16>
      %c0_12 = arith.constant 0 : index
      %c0_13 = arith.constant 0 : index
      %22 = vector.load %arg8[%c0_12, %c0_13] : memref<32x16xbf16, #tpu.memory_space<vmem>>, vector<32x16xbf16>
      tpu.vector_store %arg8[%c0_12, %c0_13], %21 {strides = array<i32>} : memref<32x16xbf16, #tpu.memory_space<vmem>>, vector<32x16xbf16>,
      %c0_14 = arith.constant 0 : index
      %c0_15 = arith.constant 0 : index
      %23 = vector.load %arg9[%c0_14, %c0_15] : memref<32x1xf32, #tpu.memory_space<vmem>>, vector<32x1xf32>
      tpu.vector_store %arg9[%c0_14, %c0_15], %16 {strides = array<i32>} : memref<32x1xf32, #tpu.memory_space<vmem>>, vector<32x1xf32>,
      %c0_16 = arith.constant 0 : index
      %c0_17 = arith.constant 0 : index
      %24 = vector.load %arg10[%c0_16, %c0_17] : memref<32x1xf32, #tpu.memory_space<vmem>>, vector<32x1xf32>
      %25 = arith.maximumf %24, %16 : vector<32x1xf32>
      %c0_18 = arith.constant 0 : index
      %c0_19 = arith.constant 0 : index
      %26 = vector.load %arg11[%c0_18, %c0_19] : memref<32x1xf32, #tpu.memory_space<vmem>>, vector<32x1xf32>
      %27 = arith.subf %24, %25 : vector<32x1xf32>
      %28 = math.exp %27 : vector<32x1xf32>
      %29 = arith.mulf %26, %28 : vector<32x1xf32>
      %cst_20 = arith.constant dense<0.000000e+00> : vector<32xf32>
      %30 = vector.multi_reduction <add>, %19, %cst_20 [1] : vector<32x16xf32> to vector<32xf32>
      %31 = vector.shape_cast %30 : vector<32xf32> to vector<32x1xf32>
      %32 = arith.subf %16, %25 : vector<32x1xf32>
      %33 = math.exp %32 : vector<32x1xf32>
      %34 = arith.mulf %31, %33 : vector<32x1xf32>
      %35 = arith.addf %29, %34 : vector<32x1xf32>
      %c0_21 = arith.constant 0 : index
      %c0_22 = arith.constant 0 : index
      %36 = vector.load %arg11[%c0_21, %c0_22] : memref<32x1xf32, #tpu.memory_space<vmem>>, vector<32x1xf32>
      tpu.vector_store %arg11[%c0_21, %c0_22], %35 {strides = array<i32>} : memref<32x1xf32, #tpu.memory_space<vmem>>, vector<32x1xf32>,
      %c0_23 = arith.constant 0 : index
      %c0_24 = arith.constant 0 : index
      %37 = vector.load %arg10[%c0_23, %c0_24] : memref<32x1xf32, #tpu.memory_space<vmem>>, vector<32x1xf32>
      tpu.vector_store %arg10[%c0_23, %c0_24], %25 {strides = array<i32>} : memref<32x1xf32, #tpu.memory_space<vmem>>, vector<32x1xf32>,
    } else {
    }
    %c1_i32 = arith.constant 1 : i32
    %8 = arith.cmpi eq, %arg1, %c1_i32 : i32
    %9 = arith.extui %8 : i1 to i32
    %c0_i32_4 = arith.constant 0 : i32
    %10 = arith.cmpi ne, %9, %c0_i32_4 : i32
    scf.if %10 {
      %c0 = arith.constant 0 : index
      %c0_5 = arith.constant 0 : index
      %11 = vector.load %arg8[%c0, %c0_5] : memref<32x16xbf16, #tpu.memory_space<vmem>>, vector<32x16xbf16>
      %12 = arith.extf %11 : vector<32x16xbf16> to vector<32x16xf32>
      %c0_6 = arith.constant 0 : index
      %c0_7 = arith.constant 0 : index
      %13 = vector.load %arg9[%c0_6, %c0_7] : memref<32x1xf32, #tpu.memory_space<vmem>>, vector<32x1xf32>
      %c0_8 = arith.constant 0 : index
      %c0_9 = arith.constant 0 : index
      %14 = vector.load %arg10[%c0_8, %c0_9] : memref<32x1xf32, #tpu.memory_space<vmem>>, vector<32x1xf32>
      %15 = arith.subf %13, %14 : vector<32x1xf32>
      %16 = math.exp %15 : vector<32x1xf32>
      %c0_10 = arith.constant 0 : index
      %c0_11 = arith.constant 0 : index
      %17 = vector.load %arg11[%c0_10, %c0_11] : memref<32x1xf32, #tpu.memory_space<vmem>>, vector<32x1xf32>
      %18 = tpu.reciprocal %17 {approx = true} : vector<32x1xf32> -> vector<32x1xf32>
      %19 = arith.mulf %16, %18 : vector<32x1xf32>
      %20 = vector.broadcast %19 : vector<32x1xf32> to vector<32x16xf32>
      %21 = arith.mulf %12, %20 : vector<32x16xf32>
      %cst = arith.constant dense<0.000000e+00> : vector<16xf32>
      %22 = vector.multi_reduction <add>, %21, %cst [0] : vector<32x16xf32> to vector<16xf32>
      %23 = vector.shape_cast %22 : vector<16xf32> to vector<1x16xf32>
      %cst_12 = arith.constant 9.99999971E-10 : f32
      %24 = vector.broadcast %cst_12 : f32 to vector<1x16xf32>
      %25 = arith.addf %24, %23 : vector<1x16xf32>
      %26 = vector.broadcast %25 : vector<1x16xf32> to vector<32x16xf32>
      %27 = arith.divf %21, %26 : vector<32x16xf32>
      %c0_13 = arith.constant 0 : index
      %c0_14 = arith.constant 0 : index
      %28 = vector.load %arg5[%c0_13, %c0_14] : memref<4x32xbf16, #tpu.memory_space<vmem>>, vector<4x32xbf16>
      %29 = arith.truncf %27 : vector<32x16xf32> to vector<32x16xbf16>
      %cst_15 = arith.constant dense<0.000000e+00> : vector<4x16xf32>
      %30 = tpu.matmul %28, %29, %cst_15 {dimension_numbers = #tpu.dot_dimension_numbers<[1], [0], [0], [1], [0, 0, 1, 1], [], []>} : vector<4x32xbf16>, vector<32x16xbf16>, vector<4x16xf32> -> vector<4x16xf32>
      %c0_16 = arith.constant 0 : index
      %c0_17 = arith.constant 0 : index
      %31 = vector.load %arg7[%c0_16, %c0_17] : memref<4x16xbf16, #tpu.memory_space<vmem>>, vector<4x16xbf16>
      %32 = arith.extf %31 : vector<4x16xbf16> to vector<4x16xf32>
      %33 = arith.addf %30, %32 : vector<4x16xf32>
      %cst_18 = arith.constant 0.000000e+00 : f32
      %34 = vector.broadcast %cst_18 : f32 to vector<4x16xf32>
      %35 = arith.maximumf %33, %34 : vector<4x16xf32>
      %36 = arith.truncf %35 : vector<4x16xf32> to vector<4x16xbf16>
      %c0_19 = arith.constant 0 : index
      %c0_20 = arith.constant 0 : index
      %c0_21 = arith.constant 0 : index
      %37 = vector.load %arg6[%c0_19, %c0_20, %c0_21] : memref<1x4x16xbf16, #tpu.memory_space<vmem>>, vector<1x4x16xbf16>
      %38 = vector.shape_cast %37 : vector<1x4x16xbf16> to vector<4x16xbf16>
      %39 = vector.shape_cast %36 : vector<4x16xbf16> to vector<1x4x16xbf16>
      tpu.vector_store %arg6[%c0_19, %c0_20, %c0_21], %39 {strides = array<i32>} : memref<1x4x16xbf16, #tpu.memory_space<vmem>>, vector<1x4x16xbf16>,
    } else {
    }
    return
  }
  func.func @transform_0(%arg0: i32, %arg1: i32, %arg2: i32) -> (i32, i32, i32) {
    %c1_i32 = arith.constant 1 : i32
    %0 = arith.subi %c1_i32, %arg1 : i32
    %1 = arith.muli %0, %arg2 : i32
    %c0_i32 = arith.constant 0 : i32
    %2 = arith.muli %arg1, %c0_i32 : i32
    %3 = arith.addi %1, %2 : i32
    %c0_i32_0 = arith.constant 0 : i32
    %c0_i32_1 = arith.constant 0 : i32
    return %arg0, %c0_i32_0, %3 : i32, i32, i32
  }
  func.func @transform_1(%arg0: i32, %arg1: i32, %arg2: i32) -> (i32, i32) {
    %c0_i32 = arith.constant 0 : i32
    %c0_i32_0 = arith.constant 0 : i32
    %c0_i32_1 = arith.constant 0 : i32
    return %c0_i32, %c0_i32_0 : i32, i32
  }
  func.func @transform_2(%arg0: i32, %arg1: i32, %arg2: i32) -> (i32, i32) {
    %c0_i32 = arith.constant 0 : i32
    %c0_i32_0 = arith.constant 0 : i32
    %c0_i32_1 = arith.constant 0 : i32
    return %c0_i32, %c0_i32_0 : i32, i32
  }
  func.func @transform_3(%arg0: i32, %arg1: i32, %arg2: i32) -> (i32, i32, i32) {
    %0 = arith.muli %arg1, %arg2 : i32
    %c0_i32 = arith.constant 0 : i32
    %c0_i32_0 = arith.constant 0 : i32
    return %arg0, %c0_i32, %0 : i32, i32, i32
  }
}

</mosaic_0001>

<bundles_post_ra>
// kernel: tpu_custom_call.1
= control target key start
LH: loop header
LB: loop body
LE: loop exit
PB: predicated region body
PF: predicated region fallthrough
CT: control target
= control target key end

     0   :  { %8 = vsyncpa [#allocation8], 0  ;;  %s1101_s0 = inlined_call_operand.vmem [shape: bf16[2,4,16], index: 0, kind: input, shape index: {}]   ;;  %s1102_s1 = inlined_call_operand.vmem [shape: bf16[32,4], index: 1, kind: input, shape index: {}]   ;;  %s1103_s2 = inlined_call_operand.vmem [shape: bf16[4,32], index: 2, kind: input, shape index: {}]   ;;  %s1104_s3 = inlined_call_operand.hbm [shape: bf16[2,4,16], index: 3, kind: output, shape index: {}]  }
   0x1   :  { %10 = vsyncpa [#allocation8 + $0x1], 0  ;;  %s930_s12 = smov 0   ;;  %s932_s13 = smov 0  }
   0x2   :  { %s934_s14 = smov 0   ;;  %s936_s15 = smov 0  }
   0x3   :  { %s938_s16 = smov 0   ;;  %s940_s17 = smov 0  }
   0x4   :  { %s942_s18 = smov 0   ;;  %s944_s19 = smov 0  }
   0x5 LB: > { %s645_s20 = sadd.s32 4294967295, %s902_s19   ;;  %s646_s21 = sadd.s32 4294967294, %s902_s19   ;;  %s902_s19 = sphi %s944_s19, %s16_s19   ;;  %s898_s18 = sphi %s942_s18, %s1113_s18   ;;  %s894_s17 = sphi %s940_s17, %s1112_s17   ;;  %s890_s16 = sphi %s938_s16, %s1111_s16   ;;  %s886_s15 = sphi %s936_s15, %s1110_s15   ;;  %s882_s14 = sphi %s934_s14, %s1109_s14   ;;  %s878_s13 = sphi %s932_s13, %s1108_s13   ;;  %s874_s12 = sphi %s930_s12, %s1107_s12  }
   0x6   : > { %s31_s22 = sadd.s32 1, %s894_s17  ;;  %s35_s23 = sadd.s32 1, %s898_s18 }
   0x7   : > { %p33_p0 = scmp.ge.s32.totalorder %s31_s22, 2  ;;  %p130_p1 = scmp.ne.s32.totalorder %s882_s14, %s878_s13 }
   0x8   : > { %p131_p2 = scmp.eq.s32.totalorder %s645_s20, 3  ;;  %p136_p4 = scmp.ne.s32.totalorder %s878_s13, %s874_s12 }
   0x9   : > { %s1115_s22 = smov (%p33_p0, %s31_s22), 0  ;;  %s1117_s23 = smov (!%p33_p0, %s35_s23), %s898_s18 }
   0xa   : > { %p979_p3 = por %p131_p2, %p130_p1  ;;  %p37_p5 = scmp.ge.s32.totalorder %s1117_s23, 2 }
   0xb   : > { %p137_p6 = scmp.eq.s32.totalorder %s646_s21, 3  ;;  %p649_p7 = scmp.ge.s32.totalorder %s902_s19, 1 }
   0xc   : > { %p175_p8 = scmp.lt.s32.totalorder %s902_s19, 5  ;;  %s1119_s23 = smov (%p37_p5, %s1117_s23), 0 }
   0xd   : > { %p989_p9 = por %p137_p6, %p136_p4  ;;  %s115_s26 = ssub.s32 %s898_s18, %s1119_s23 }
   0xe   : > { %p176_p10 = pnand %p649_p7, %p175_p8  ;;  %s120_s27 = sadd.s32 1, %s882_s14 }
   0xf   : > { %p118_p11 = scmp.eq.s32.totalorder %s115_s26, 0  ;;  %s200_s29 = sand.u32 (!%p176_p10), 1, %s878_s13  }
  0x10   : > { %179 = sbr.rel (%p176_p10) target bundleno = 1007 (0x3ef), region = 32  ;;  %p205_p12 = scmp.lt.s32.totalorder (!%p176_p10), %s890_s16, 1 }
  0x11   : > { %s997_s28 = scalar_select %p118_p11, %s882_s14, %s120_s27  }
  0x12   : > { %s1003_s30 = sshll.u32 (!%p176_p10), %s200_s29, 1  ;;  %p216_p13 = scmp.eq.s32.totalorder (!%p176_p10), %s886_s15, 0 }
  0x13   : > { %s202_s9 = scalar_lea.vmem (!%p176_p10), [#allocation7], %s1003_s30 }
  0x17   : > { %s206_s4 = scalar_select %p205_p12, %s890_s16, 1 }
  0x18   : > { %221 = sbr.rel (!%p216_p13) target bundleno = 31 (0x1f), region = 36  ;;  %vm222_vm0 = vcmask (%p216_p13), 7168   ;;  %v904_v0 = vmov (%p216_p13), -1e+30   ;;  %v905_v1 = vmov (%p216_p13), 0.0  }
  0x19   : > { %s651_s5 = sshll.u32 %s206_s4, 1  ;;  %223 = vst.msk [vmem:[#allocation5] sm:$0xff] (%p216_p13), %vm222_vm0, %v904_v0  ;;  %224 = vst.msk [vmem:[#allocation5 + $0x8] sm:$0xff] (%p216_p13), %vm222_vm0, %v904_v0 }
  0x1a   : > { %s211_s8 = scalar_lea.vmem %s1101_s0, %s651_s5  ;;  %225 = vst.msk [vmem:[#allocation5 + $0x10] sm:$0xff] (%p216_p13), %vm222_vm0, %v904_v0  ;;  %226 = vst.msk [vmem:[#allocation5 + $0x18] sm:$0xff] (%p216_p13), %vm222_vm0, %v904_v0 }
  0x1b   : > { %227 = vst.msk [vmem:[#allocation6] sm:$0xff] (%p216_p13), %vm222_vm0, %v905_v1  ;;  %228 = vst.msk [vmem:[#allocation6 + $0x8] sm:$0xff] (%p216_p13), %vm222_vm0, %v905_v1 }
  0x1c   : > { %229 = vst.msk [vmem:[#allocation6 + $0x10] sm:$0xff] (%p216_p13), %vm222_vm0, %v905_v1  ;;  %230 = vst.msk [vmem:[#allocation6 + $0x18] sm:$0xff] (%p216_p13), %vm222_vm0, %v905_v1 }
  0x1f PF: > { %p653_p0 = scmp.ne.s32.totalorder %s886_s15, 0 }
  0x20   : > { %v234_v2 = vld [vmem:[%s211_s8] sm:$0x3] (!%p653_p0)  ;;  %vm256_vm1 = vcmask (!%p653_p0), 1041408   ;;  %vm334_vm2 = vcmask (!%p653_p0), 123904   ;;  %vm249_vm3 = vcmask (!%p653_p0), 31744   ;;  %v763_v5 = vld [vmem:[%s1102_s1 + $0x8] sm:$0xff] (!%p653_p0)  }
  0x21   : > { %233 = sbr.rel (%p653_p0) target bundleno = 564 (0x234), region = 40  ;;  %685 = vmatprep.subr.msk.bf16.mxu0 (!%p653_p0), %vm256_vm1, %v234_v2  ;;  %335 = vst.msk [vmem:[#allocation2] sm:$0x3] (!%p653_p0), %vm334_vm2, %v234_v2  ;;  %v258_v3 = vsel (!%p653_p0), %vm256_vm1, %v234_v2, 0  ;;  %v762_v4 = vld [vmem:[%s1102_s1] sm:$0xff] (!%p653_p0)   ;;  %vm309_vm4 = vcmask (!%p653_p0), 130048  }
  0x22   : > { %672 = vmatpush3.bf16.msra.mxu0 (!%p653_p0), %v258_v3  ;;  %673 = vmatprep.mubr.msk.bf16.mxu0 (!%p653_p0), %vm249_vm3, %v762_v4  ;;  %vm340_vm5 = vcmask (!%p653_p0), 7168   ;;  %v347_v14 = vld [vmem:[#allocation5 + $0x10] sm:$0xff] (!%p653_p0)  ;;  %v345_v15 = vld [vmem:[#allocation5] sm:$0xff] (!%p653_p0)  ;;  %v348_v24 = vld [vmem:[#allocation5 + $0x18] sm:$0xff] (!%p653_p0) }
  0x23   : > { %v346_v30 = vld [vmem:[#allocation5 + $0x8] sm:$0xff] (!%p653_p0)  ;;  %v353_v61 = vld [vmem:[#allocation6] sm:$0xff] (!%p653_p0)  ;;  %v355_v3 = vld [vmem:[#allocation6 + $0x10] sm:$0xff] (!%p653_p0) }
  0x25   : > { %674 = vmatmul.mubr.msk.bf16.vlgmr.msra.gmra.mrb[0].mxu0 (!%p653_p0), %vm249_vm3, %v763_v5 }
  0xf8   : > { %v675_v6 = vpop.f32.mrb[0].mxu0 }
  0xf9   : > { %v294_v7 = vpop.f32.mrb[1].mxu0  ;;  %v316_v8 = vsel %vm309_vm4, %v675_v6, -inf }
  0xfa   : > { %317 = vmax.xlane.f32.xlu1 %v316_v8  ;;  %v676_v9 = vpop.f32.mrb[2].mxu0  ;;  %v310_v10 = vsel %vm309_vm4, %v294_v7, -inf }
  0xfb   : > { %311 = vmax.xlane.f32.xlu0 %v310_v10  ;;  %v297_v11 = vpop.f32.mrb[3].mxu0  ;;  %v319_v12 = vsel %vm309_vm4, %v676_v9, -inf  ;;  %v354_v10 = vld [vmem:[#allocation6 + $0x8] sm:$0xff] }
  0xfc   : > { %v313_v13 = vsel %vm309_vm4, %v297_v11, -inf }
  0xfe   : > { %320 = vmax.xlane.f32.xlu1 %v319_v12 }
  0xff   : > { %314 = vmax.xlane.f32.xlu0 %v313_v13 }
 0x187   : > { %v318_v16 = vpop.xlane.xlu1 %317 }
 0x188   : > { %v324_v17 = vsub.f32 %v675_v6, %v318_v16  ;;  %343 = vst.msk [vmem:[#allocation4 + $0x10] sm:$0xff] %vm340_vm5, %v318_v16  ;;  %v351_v18 = vmax.f32 %v347_v14, %v318_v16  ;;  %v312_v19 = vpop.xlane.xlu0 %311 }
 0x189   : > { %v322_v20 = vsub.f32 %v294_v7, %v312_v19  ;;  %341 = vst.msk [vmem:[#allocation4] sm:$0xff] %vm340_vm5, %v312_v19  ;;  %v349_v21 = vmax.f32 %v345_v15, %v312_v19 }
 0x18a   : > { %v359_v22 = vsub.f32 %v347_v14, %v351_v18  ;;  %v387_v23 = vsub.f32 %v318_v16, %v351_v18  ;;  %411 = vst.msk [vmem:[#allocation5 + $0x10] sm:$0xff] %vm340_vm5, %v351_v18  ;;  %v330_v25 = vmul.f32 1.442695, %v324_v17  ;;  %v356_v17 = vld [vmem:[#allocation6 + $0x18] sm:$0xff] }
 0x18b   : > { %v326_v26 = vmul.f32 1.442695, %v322_v20  ;;  %v357_v27 = vsub.f32 %v345_v15, %v349_v21  ;;  %v385_v28 = vsub.f32 %v312_v19, %v349_v21  ;;  %409 = vst.msk [vmem:[#allocation5] sm:$0xff] %vm340_vm5, %v349_v21  ;;  %v321_v29 = vpop.xlane.xlu1 %320 }
 0x18c   : > { %v325_v31 = vsub.f32 %v676_v9, %v321_v29  ;;  %344 = vst.msk [vmem:[#allocation4 + $0x18] sm:$0xff] %vm340_vm5, %v321_v29  ;;  %v315_v32 = vpop.xlane.xlu0 %314  ;;  %v352_v33 = vmax.f32 %v348_v24, %v321_v29  ;;  %v365_v52 = vmul.f32 1.442695, %v359_v22  ;;  %v393_v53 = vmul.f32 1.442695, %v387_v23 }
 0x18d   : > { %764 = vpow2.f32 %v326_v26  ;;  %342 = vst.msk [vmem:[#allocation4 + $0x8] sm:$0xff] %vm340_vm5, %v315_v32  ;;  %v323_v35 = vsub.f32 %v297_v11, %v315_v32  ;;  %v350_v36 = vmax.f32 %v346_v30, %v315_v32  ;;  %v361_v50 = vmul.f32 1.442695, %v357_v27 }
 0x18e   : > { %v332_v34 = vmul.f32 1.442695, %v325_v31  ;;  %766 = vpow2.f32 %v330_v25  ;;  %v360_v37 = vsub.f32 %v348_v24, %v352_v33  ;;  %412 = vst.msk [vmem:[#allocation5 + $0x18] sm:$0xff] %vm340_vm5, %v352_v33  ;;  %v389_v51 = vmul.f32 1.442695, %v385_v28 }
 0x18f   : > { %v358_v38 = vsub.f32 %v346_v30, %v350_v36  ;;  %410 = vst.msk [vmem:[#allocation5 + $0x8] sm:$0xff] %vm340_vm5, %v350_v36  ;;  %v328_v39 = vmul.f32 1.442695, %v323_v35  ;;  %v386_v54 = vsub.f32 %v315_v32, %v350_v36  ;;  %v388_v56 = vsub.f32 %v321_v29, %v352_v33 }
 0x190   : > { %768 = vpow2.f32 %v332_v34  ;;  %v367_v58 = vmul.f32 1.442695, %v360_v37 }
 0x191   : > { %770 = vpow2.f32 %v328_v39  ;;  %v363_v55 = vmul.f32 1.442695, %v358_v38  ;;  %v391_v57 = vmul.f32 1.442695, %v386_v54  ;;  %v395_v60 = vmul.f32 1.442695, %v388_v56 }
 0x192   : > { %772 = vpow2.f32 %v361_v50 }
 0x193   : > { %774 = vpow2.f32 %v389_v51 }
 0x194   : > { %776 = vpow2.f32 %v365_v52 }
 0x195   : > { %778 = vpow2.f32 %v393_v53 }
 0x196   : > { %780 = vpow2.f32 %v363_v55 }
 0x197   : > { %v765_v40 = vpop.eup %764  ;;  %782 = vpow2.f32 %v391_v57 }
 0x198   : > { %v373_v41 = vsel %vm309_vm4, %v765_v40, 0.0  ;;  %v767_v42 = vpop.eup %766  ;;  %784 = vpow2.f32 %v367_v58 }
 0x199   : > { %374 = vadd.xlane.f32.xlu0 %v373_v41  ;;  %v379_v44 = vsel %vm309_vm4, %v767_v42, 0.0  ;;  %786 = vpow2.f32 %v395_v60 }
 0x19a   : > { %v769_v43 = vpop.eup %768 }
 0x19b   : > { %v337_v45 = vpack.c.bf16 %v769_v43, %v767_v42  ;;  %v771_v46 = vpop.eup %770  ;;  %v382_v49 = vsel %vm309_vm4, %v769_v43, 0.0 }
 0x19c   : > { %v336_v47 = vpack.c.bf16 %v771_v46, %v765_v40  ;;  %v376_v48 = vsel %vm309_vm4, %v771_v46, 0.0  ;;  %v773_v59 = vpop.eup %772 }
 0x19d   : > { %380 = vadd.xlane.f32.xlu0 %v379_v44  ;;  %339 = vst.msk [vmem:[#allocation3 + $0x8] sm:$0xff] %vm309_vm4, %v337_v45  ;;  %377 = vadd.xlane.f32.xlu1 %v376_v48  ;;  %v775_v62 = vpop.eup %774  ;;  %v369_v0 = vmul.f32 %v773_v59, %v353_v61 }
 0x19e   : > { %338 = vst.msk [vmem:[#allocation3] sm:$0xff] %vm309_vm4, %v336_v47  ;;  %v777_v2 = vpop.eup %776 }
 0x19f   : > { %v779_v5 = vpop.eup %778  ;;  %v371_v7 = vmul.f32 %v777_v2, %v355_v3 }
 0x1a0   : > { %v781_v9 = vpop.eup %780 }
 0x1a1   : > { %383 = vadd.xlane.f32.xlu1 %v382_v49  ;;  %v783_v12 = vpop.eup %782  ;;  %v370_v14 = vmul.f32 %v781_v9, %v354_v10 }
 0x1a2   : > { %v785_v16 = vpop.eup %784 }
 0x1a3   : > { %v787_v19 = vpop.eup %786  ;;  %v372_v21 = vmul.f32 %v785_v16, %v356_v17 }
 0x226   : > { %v375_v63 = vpop.xlane.xlu0 %374 }
 0x227   : > { %v397_v1 = vmul.f32 %v775_v62, %v375_v63 }
 0x229   : > { %v401_v4 = vadd.f32 %v397_v1, %v369_v0 }
 0x22a   : > { %v381_v6 = vpop.xlane.xlu0 %380  ;;  %v378_v13 = vpop.xlane.xlu1 %377 }
 0x22b   : > { %405 = vst.msk [vmem:[#allocation6] sm:$0xff] %vm340_vm5, %v401_v4  ;;  %v399_v8 = vmul.f32 %v779_v5, %v381_v6  ;;  %v398_v15 = vmul.f32 %v783_v12, %v378_v13 }
 0x22d   : > { %v403_v11 = vadd.f32 %v399_v8, %v371_v7  ;;  %v402_v18 = vadd.f32 %v398_v15, %v370_v14 }
 0x22e   : > { %v384_v20 = vpop.xlane.xlu1 %383 }
 0x22f   : > { %407 = vst.msk [vmem:[#allocation6 + $0x10] sm:$0xff] %vm340_vm5, %v403_v11  ;;  %406 = vst.msk [vmem:[#allocation6 + $0x8] sm:$0xff] %vm340_vm5, %v402_v18  ;;  %v400_v22 = vmul.f32 %v787_v19, %v384_v20 }
 0x231   : > { %v404_v23 = vadd.f32 %v400_v22, %v372_v21 }
 0x233   : > { %408 = vst.msk [vmem:[#allocation6 + $0x18] sm:$0xff] %vm340_vm5, %v404_v23 }
 0x234 PF: > { %p658_p1 = scmp.ne.s32.totalorder %s886_s15, 1 }
 0x235   : > { %v425_v24 = vld [vmem:[#allocation4 + $0x10] sm:$0xff] (!%p658_p1)  ;;  %v906_v27 = vmov (!%p658_p1), 0   ;;  %v423_v29 = vld [vmem:[#allocation4] sm:$0xff] (!%p658_p1)  ;;  %v426_v33 = vld [vmem:[#allocation4 + $0x18] sm:$0xff] (!%p658_p1)  ;;  %v907_v57 = vmov (!%p658_p1), 0.0   ;;  %vm908_vm6 = vmmov (!%p658_p1), 0  }
 0x236   : > { %416 = sbr.rel (%p658_p1) target bundleno = 983 (0x3d7), region = 44  ;;  %v429_v25 = vld [vmem:[#allocation5 + $0x10] sm:$0xff] (!%p658_p1)  ;;  %789 = vset.pattern.permute.xlu1 (!%p658_p1), %v906_v27  ;;  %788 = vset.pattern.permute.xlu0 (!%p658_p1), %v906_v27  ;;  %v427_v30 = vld [vmem:[#allocation5] sm:$0xff] (!%p658_p1)  ;;  %v430_v34 = vld [vmem:[#allocation5 + $0x18] sm:$0xff] (!%p658_p1)  ;;  %vm479_vm7 = vcmask (!%p658_p1), 130048   ;;  %vm504_vm8 = vcmask (!%p658_p1), 261120  }
 0x237   : > { %v445_v26 = vld [vmem:[#allocation6 + $0x10] sm:$0xff] (!%p658_p1)  ;;  %v433_v28 = vsub.f32 (!%p658_p1), %v425_v24, %v429_v25  ;;  %v443_v31 = vld [vmem:[#allocation6] sm:$0xff] (!%p658_p1)  ;;  %v431_v32 = vsub.f32 (!%p658_p1), %v423_v29, %v427_v30  ;;  %v434_v37 = vsub.f32 (!%p658_p1), %v426_v33, %v430_v34  ;;  %v424_v38 = vld [vmem:[#allocation4 + $0x8] sm:$0xff] (!%p658_p1)  ;;  %677 = vmatprep.subr.bf16.mxu0 (!%p658_p1), %v907_v57  ;;  %681 = vmatprep.mubr.msk.bf16.mxu0 (!%p658_p1), %vm908_vm6, %v907_v57  ;;  %vm550_vm9 = vcmask (!%p658_p1), 123904  }
 0x238   : > { %790 = vrcp.f32 (!%p658_p1), %v445_v26  ;;  %v428_v39 = vld [vmem:[#allocation5 + $0x8] sm:$0xff] (!%p658_p1)  ;;  %v417_v58 = vld [vmem:[#allocation3] sm:$0xff] (!%p658_p1)  ;;  %v418_v59 = vld [vmem:[#allocation3 + $0x8] sm:$0xff] (!%p658_p1) }
 0x239   : > { %792 = vrcp.f32 (!%p658_p1), %v443_v31  ;;  %v439_v36 = vmul.f32 (!%p658_p1), 1.442695, %v433_v28  ;;  %v444_v40 = vld [vmem:[#allocation6 + $0x8] sm:$0xff] (!%p658_p1)  ;;  %v435_v41 = vmul.f32 (!%p658_p1), 1.442695, %v431_v32  ;;  %v432_v42 = vsub.f32 (!%p658_p1), %v424_v38, %v428_v39 }
 0x23a   : > { %v446_v35 = vld [vmem:[#allocation6 + $0x18] sm:$0xff] (!%p658_p1)  ;;  %v441_v43 = vmul.f32 (!%p658_p1), 1.442695, %v434_v37  ;;  %v419_v61 = vunpack.c.l.bf16 (!%p658_p1), %v417_v58  ;;  %v421_v63 = vunpack.c.l.bf16 (!%p658_p1), %v418_v59  ;;  %v420_v0 = vunpack.c.h.bf16 (!%p658_p1), %v417_v58  ;;  %v499_v29 = vld [vmem:[%s1103_s2] sm:$0x3] (!%p658_p1) }
 0x23b   : > { %794 = vrcp.f32 (!%p658_p1), %v446_v35  ;;  %v437_v44 = vmul.f32 (!%p658_p1), 1.442695, %v432_v42  ;;  %v422_v2 = vunpack.c.h.bf16 (!%p658_p1), %v418_v59  ;;  %v502_v30 = vld [vmem:[#allocation2] sm:$0x3] (!%p658_p1) }
 0x23c   : > { %796 = vrcp.f32 (!%p658_p1), %v444_v40  ;;  %v503_v31 = vunpack.c.l.bf16 (!%p658_p1), %v502_v30 }
 0x23d   : > { %798 = vpow2.f32 %v439_v36 }
 0x23e   : > { %800 = vpow2.f32 %v435_v41 }
 0x23f   : > { %802 = vpow2.f32 %v441_v43 }
 0x240   : > { %804 = vpow2.f32 %v437_v44 }
 0x242   : > { %v791_v45 = vpop.eup %790 }
 0x243   : > { %v793_v46 = vpop.eup %792 }
 0x245   : > { %v795_v47 = vpop.eup %794 }
 0x246   : > { %v797_v48 = vpop.eup %796 }
 0x247   : > { %v799_v49 = vpop.eup %798 }
 0x248   : > { %v801_v50 = vpop.eup %800  ;;  %v453_v51 = vmul.f32 %v799_v49, %v791_v45 }
 0x249   : > { %v803_v52 = vpop.eup %802  ;;  %v451_v53 = vmul.f32 %v801_v50, %v793_v46 }
 0x24a   : > { %v805_v54 = vpop.eup %804  ;;  %467 = vperm.xlu1 %789, %v453_v51   ;;  %v454_v55 = vmul.f32 %v803_v52, %v795_v47 }
 0x24b   : > { %457 = vperm.xlu0 %788, %v451_v53   ;;  %v452_v56 = vmul.f32 %v805_v54, %v797_v48 }
 0x24e   : > { %472 = vperm.xlu1 %789, %v454_v55  }
 0x24f   : > { %462 = vperm.xlu0 %788, %v452_v56  }
 0x2c9   : > { %v468_v60 = vpop.permute.xlu1 %467 }
 0x2ca   : > { %v458_v62 = vpop.permute.xlu0 %457  ;;  %v477_v5 = vmul.f32 %v468_v60, %v421_v63 }
 0x2cb   : > { %v475_v1 = vmul.f32 %v458_v62, %v419_v61 }
 0x2cc   : > { %v483_v11 = vsel %vm479_vm7, %v477_v5, 0.0 }
 0x2cd   : > { %v473_v3 = vpop.permute.xlu1 %472  ;;  %v480_v7 = vsel %vm479_vm7, %v475_v1, 0.0 }
 0x2ce   : > { %v463_v4 = vpop.permute.xlu0 %462  ;;  %v478_v8 = vmul.f32 %v473_v3, %v422_v2 }
 0x2cf   : > { %v476_v6 = vmul.f32 %v463_v4, %v420_v0 }
 0x2d0   : > { %v485_v13 = vsel %vm479_vm7, %v478_v8, 0.0 }
 0x2d1   : > { %v481_v9 = vsel %vm479_vm7, %v476_v6, 0.0 }
 0x2d2   : > { %v482_v10 = vadd.f32 %v481_v9, %v480_v7 }
 0x2d4   : > { %v484_v12 = vadd.f32 %v483_v11, %v482_v10 }
 0x2d6   : > { %v486_v14 = vadd.f32 %v485_v13, %v484_v12 }
 0x2d8   : > { %v487_v15 = vrot.slane %v486_v14, 4 }
 0x2da   : > { %v488_v16 = vadd.f32 %v487_v15, %v486_v14 }
 0x2dc   : > { %v489_v17 = vrot.slane %v488_v16, 2 }
 0x2de   : > { %v490_v18 = vadd.f32 %v489_v17, %v488_v16 }
 0x2e0   : > { %v491_v19 = vrot.slane %v490_v18, 1 }
 0x2e2   : > { %v492_v20 = vadd.f32 %v491_v19, %v490_v18 }
 0x2e4   : > { %v493_v21 = vadd.f32 1e-09, %v492_v20 }
 0x2e6   : > { %806 = vrcp.f32 %v493_v21 }
 0x2f0   : > { %v807_v22 = vpop.eup %806 }
 0x2f1   : > { %v496_v23 = vmul.f32 %v807_v22, %v476_v6  ;;  %v495_v24 = vmul.f32 %v807_v22, %v475_v1  ;;  %v497_v26 = vmul.f32 %v807_v22, %v477_v5  ;;  %v498_v27 = vmul.f32 %v807_v22, %v478_v8 }
 0x2f3   : > { %v500_v25 = vpack.c.bf16 %v496_v23, %v495_v24  ;;  %v501_v28 = vpack.c.bf16 %v498_v27, %v497_v26 }
 0x2f5   : > { %678 = vmatpush3.bf16.msra.mxu0 %v500_v25 }
 0x2f6   : > { %679 = vmatprep.subr.bf16.mxu0 %v907_v57 }
 0x2f9   : > { %680 = vmatpush3.bf16.msra.mxu0 %v501_v28 }
 0x2fc   : > { %682 = vmatmul.mubr.msk.bf16.vlgmr.msra.gmra.mrb[0].mxu0 %vm504_vm8, %v499_v29 }
 0x3cf   : > { %v542_v32 = vpop.f32.mrb[0].mxu0 }
 0x3d0   : > { %v543_v33 = vadd.f32 %v542_v32, %v503_v31  ;;  %v683_v34 = vpop.f32.mrb[1].mxu0 }
 0x3d1   : > { %v545_v35 = vpop.f32.mrb[2].mxu0 }
 0x3d2   : > { %v548_v36 = vmax.f32 %v543_v33, 0.0  ;;  %v684_v37 = vpop.f32.mrb[3].mxu0 }
 0x3d4   : > { %v549_v38 = vpack.c.bf16 %v548_v36, %v548_v36 }
 0x3d6   : > { %551 = vst.msk [vmem:[%s202_s9] sm:$0x3] %vm550_vm9, %v549_v38 }
 0x3d7 PF: > { %s661_s27 = sshll.u32 %s890_s16, 5  ;;  %s568_s7 = sshll.u32 %s202_s9, 4  ;;  %s569_s7 = int_to_ptr.vmem [resolvable:$true] %s568_s7 }
 0x3d8   : > { %s1050_s6 = scalar_lea.hbm %s1104_s3, %s661_s27  ;;  %s553_s8 = scalar_lea.sflag [#allocation8], %s200_s29 }
 0x3d9   : > { %s808_s10 = scalar_lea.vmem %s569_s7, 32  ;;  %s909_s11 = smov [#allocation7]  }
 0x3da   : > { %p809_p2 = scmp.ne.s32.totalorder %s569_s7, %s808_s10  ;;  %s812_s20 = sshll.u32 %s909_s11, 4  ;;  %s813_s20 = int_to_ptr.vmem [resolvable:$false] %s812_s20 }
 0x3db   : > { %s814_s21 = scalar_lea.vmem %s813_s20, 64  ;;  %p815_p6 = scmp.lt.s32.totalorder %s569_s7, %s813_s20 }
 0x3dc   : > { %p810_p4 = pnand %p809_p2, %p979_p3  ;;  %p816_p7 = scmp.lt.s32.totalorder %s814_s21, %s808_s10 }
 0x3de   : > { %p811_p5 = pneg %p810_p4  ;;  %p817_p8 = por %p816_p7, %p815_p6 }
 0x3e0   : > { %p818_p10 = pnand %p817_p8, %p811_p5 }
 0x3e2   : > { %821 = shalt.err (!%p818_p10)
}
 0x3e3   : > { %s822_s16 = scalar_lea.hbm %s1050_s6, 32  ;;  %s826_s9 = scalar_lea.hbm %s1104_s3, 64 }
 0x3e4   : > { %p823_p11 = scmp.ne.s32.totalorder %s1050_s6, %s822_s16  ;;  %p827_p0 = scmp.lt.u32.totalorder %s1050_s6, %s1104_s3 }
 0x3e5   : > { %p828_p1 = scmp.lt.u32.totalorder %s826_s9, %s822_s16  ;;  %p830_p4 = scmp.lt.u32.totalorder %s822_s16, %s1050_s6 }
 0x3e6   : > { %p824_p12 = pnand %p823_p11, %p979_p3 }
 0x3e7   : > { %p829_p2 = por %p828_p1, %p827_p0 }
 0x3e8   : > { %p825_p13 = pneg %p824_p12 }
 0x3e9   : > { %p831_p5 = por %p830_p4, %p829_p2 }
 0x3eb   : > { %p832_p6 = pnand %p831_p5, %p825_p13 }
 0x3ed   : > { %835 = shalt.err (!%p832_p6)
}
 0x3ee   : > { %686 = dma.vmem_to_hbm [thread:$0]  (%p979_p3), %s569_s7, 32, %s1050_s6, %s553_s8  }
 0x3ef PF: > { %p692_p7 = scmp.ge.s32.totalorder %s902_s19, 2  ;;  %s580_s27 = sand.u32 1, %s874_s12  }
 0x3f0   : > { %s581_s4 = scalar_lea.sflag [#allocation8], %s580_s27 }
 0x3f1   : > { %p689_p8 = pnand %p692_p7, %p989_p9 }
 0x3f3   : > { %869 = dma.done.wait (!%p689_p8), %s581_s4, 32  }
 0x3f4   : > { %871 = vsyncadd (!%p689_p8), %s581_s4, 4294967264  ;;  %s16_s19 = sadd.s32 1, %s902_s19   ;;  %s1107_s12 = smov %s878_s13 }
 0x3f5   : > { %p13_p10 = scmp.ge.s32.totalorder %s16_s19, 6   ;;  %s1108_s13 = smov %s882_s14 }
 0x3f6   : > { %s1109_s14 = smov %s997_s28  ;;  %s1110_s15 = smov %s894_s17 }
 0x3f7   : > { %s1111_s16 = smov %s898_s18  ;;  %s1112_s17 = smov %s1115_s22 }
 0x3f8   : > { %s1113_s18 = smov %s1119_s23  ;;  %15 = sbr.rel (!%p13_p10) target bundleno = 5 (0x5), region = 79 }
 0x3ff   :  { %586 = vsyncpa [#allocation8], 1 }
 0x400   :  { %588 = vsyncpa [#allocation8 + $0x1], 1 }

</bundles_post_ra>
